<compile_context>
chip_gen: v7x
topology: tpu7x:2x2x1
jax: 0.10.0
libtpu: 0.0.40
codegen_flags: <defaults>
</compile_context>

<pallas_src>
import functools
import numpy as np
import jax
import jax.numpy as jnp
from jax import lax
from jax.experimental import pallas as pl
from jax.experimental.pallas import tpu as pltpu

FEAT = 1280   # mobilenet_v3_large feature width (classifier[-1] remapped 1280->1280)
HID = 512     # LSTM hidden size
GATES = 4 * HID


def _device_kind():
    try:
        return jax.devices()[0].device_kind.lower()
    except Exception:
        return ""


def _vmem_limit_bytes():
    kind = _device_kind()
    if "v7" in kind:
        return 56 * 1024 * 1024      # v7x: 64 MiB physical VMEM per TensorCore
    if "v5" in kind or "v6" in kind:
        return 100 * 1024 * 1024     # v5e/v6e: 128 MiB physical VMEM
    return 48 * 1024 * 1024          # unknown chip: conservative


def _pick_tile(dim, pref, align):
    """Largest tile <= pref that divides dim and is a multiple of `align`;
    falls back to the full dim (always a legal block dim)."""
    if dim <= pref:
        return dim
    t = pref
    while t >= align:
        if dim % t == 0:
            return t
        t -= align
    # TODO(synk): for awkward huge dims a pad-to-multiple path would be needed
    # to guarantee the fallback block stays inside the VMEM limit.
    return dim


def _time_chunk(T):
    if T <= 8:
        return T
    for tc in (16, 8):
        if T % tc == 0:
            return tc
    return T


# ----------------------------------------------------------------------------
# Kernel 1: generic tiled matmul + bias   out = x @ w + b
#   grid = (M/tm, N/tn, K/tk), f32 VMEM accumulator, reduction axis last.
# ----------------------------------------------------------------------------
def _mm_bias_kernel(x_ref, w_ref, b_ref, o_ref, acc_ref):
    @pl.when(pl.program_id(2) == 0)
    def _():
        acc_ref[...] = jnp.zeros_like(acc_ref)

    acc_ref[...] += jnp.dot(x_ref[...], w_ref[...],
                            preferred_element_type=jnp.float32)

    @pl.when(pl.program_id(2) == pl.num_programs(2) - 1)
    def _():
        o_ref[...] = (acc_ref[...] + b_ref[...]).astype(o_ref.dtype)


def matmul_bias(x, w, b, out_dtype):
    M0, K = x.shape
    K2, N = w.shape
    assert K == K2
    # Pad rows to a multiple of 16 (bf16 sublane packing) so tm is well aligned.
    M = ((M0 + 15) // 16) * 16
    if M != M0:
        x = jnp.pad(x, ((0, M - M0), (0, 0)))
    tm = _pick_tile(M, 512, 16)
    tn = _pick_tile(N, 512, 128)
    tk = _pick_tile(K, 512, 128)
    grid = (M // tm, N // tn, K // tk)
    out = pl.pallas_call(
        _mm_bias_kernel,
        out_shape=jax.ShapeDtypeStruct((M, N), out_dtype),
        grid_spec=pltpu.PrefetchScalarGridSpec(
            num_scalar_prefetch=0,
            grid=grid,
            in_specs=[
                pl.BlockSpec((tm, tk), lambda i, j, k: (i, k)),
                pl.BlockSpec((tk, tn), lambda i, j, k: (k, j)),
                pl.BlockSpec((1, tn), lambda i, j, k: (0, j)),
            ],
            out_specs=pl.BlockSpec((tm, tn), lambda i, j, k: (i, j)),
            scratch_shapes=[pltpu.VMEM((tm, tn), jnp.float32)],
        ),
        compiler_params=pltpu.CompilerParams(
            dimension_semantics=("parallel", "parallel", "arbitrary"),
            vmem_limit_bytes=_vmem_limit_bytes(),
        ),
    )(x, w, b)
    return out if M == M0 else out[:M0]


# ----------------------------------------------------------------------------
# Kernel 2: 2-layer LSTM recurrence over time (input projection precomputed)
#   grid = (batch_blocks [parallel], time_chunks [arbitrary])
#   h/c state + running sum of h1 live in VMEM scratch; the output Linear is
#   applied once at the final time chunk (mean_t(h1) @ W + b).
# ----------------------------------------------------------------------------
def _lstm_kernel(g0_ref, whh0_ref, w1_ref, b1_ref, wout_ref, bout_ref,
                 out_ref, h0_ref, c0_ref, h1_ref, c1_ref, hacc_ref,
                 *, tc, inv_t, unroll):
    chunk = pl.program_id(1)

    @pl.when(chunk == 0)
    def _():
        h0_ref[...] = jnp.zeros_like(h0_ref)
        c0_ref[...] = jnp.zeros_like(c0_ref)
        h1_ref[...] = jnp.zeros_like(h1_ref)
        c1_ref[...] = jnp.zeros_like(c1_ref)
        hacc_ref[...] = jnp.zeros_like(hacc_ref)

    def cell(gates, c):
        # PyTorch gate order: i, f, g, o (f32 gate math; state stays f32)
        i = jax.nn.sigmoid(gates[:, 0 * HID:1 * HID])
        f = jax.nn.sigmoid(gates[:, 1 * HID:2 * HID])
        g = jnp.tanh(gates[:, 2 * HID:3 * HID])
        o = jax.nn.sigmoid(gates[:, 3 * HID:4 * HID])
        c_new = f * c + i * g
        h_new = o * jnp.tanh(c_new)
        return h_new, c_new

    b1 = b1_ref[...]

    def step(s, carry):
        h0, c0, h1, c1, hacc = carry
        # Time-major bf16 gate slab: sublane-contiguous (Bblk, 4H) load per step.
        g0 = g0_ref[s]
        gates0 = g0.astype(jnp.float32) + jnp.dot(
            h0.astype(jnp.bfloat16), whh0_ref[...],
            preferred_element_type=jnp.float32)
        h0, c0 = cell(gates0, c0)
        # Fused layer-1 projection: one K=1024 matmul over [h0 | h1].
        h01 = jnp.concatenate(
            [h0.astype(jnp.bfloat16), h1.astype(jnp.bfloat16)], axis=1)
        gates1 = jnp.dot(h01, w1_ref[...],
                         preferred_element_type=jnp.float32) + b1
        h1, c1 = cell(gates1, c1)
        return h0, c0, h1, c1, hacc + h1

    carry = (h0_ref[...], c0_ref[...], h1_ref[...], c1_ref[...], hacc_ref[...])
    h0, c0, h1, c1, hacc = lax.fori_loop(0, tc, step, carry, unroll=unroll)

    h0_ref[...] = h0
    c0_ref[...] = c0
    h1_ref[...] = h1
    c1_ref[...] = c1
    hacc_ref[...] = hacc

    @pl.when(chunk == pl.num_programs(1) - 1)
    def _():
        h_mean = hacc * inv_t
        out_ref[...] = (jnp.dot(h_mean, wout_ref[...],
                                preferred_element_type=jnp.float32)
                        + bout_ref[...]).astype(out_ref.dtype)


def lstm_head(gates0_tm, whh0, w1, b1, wout, bout, Bblk, T):
    T_, B_pad, G = gates0_tm.shape
    assert T_ == T and G == GATES and B_pad % Bblk == 0
    n_out = wout.shape[1]
    tc = _time_chunk(T)
    assert T % tc == 0
    unroll = 2 if tc % 2 == 0 else 1
    grid = (B_pad // Bblk, T // tc)
    kernel = functools.partial(_lstm_kernel, tc=tc, inv_t=1.0 / T, unroll=unroll)

    def call(single_buffered):
        def const_spec(shape):
            idx = lambda b, c: tuple(0 for _ in shape)
            if single_buffered:
                # Constant block index -> the default 2nd pipeline buffer is dead VMEM.
                return pl.BlockSpec(shape, idx, pipeline_mode=pl.Buffered(1))
            return pl.BlockSpec(shape, idx)

        return pl.pallas_call(
            kernel,
            out_shape=jax.ShapeDtypeStruct((B_pad, n_out), jnp.float32),
            grid_spec=pltpu.PrefetchScalarGridSpec(
                num_scalar_prefetch=0,
                grid=grid,
                in_specs=[
                    pl.BlockSpec((tc, Bblk, GATES), lambda b, c: (c, b, 0)),
                    const_spec((HID, GATES)),        # whh0 (bf16)
                    const_spec((2 * HID, GATES)),    # [wih1; whh1] fused (bf16)
                    const_spec((1, GATES)),          # b1 (f32)
                    const_spec((HID, n_out)),        # wout (f32)
                    const_spec((1, n_out)),          # bout (f32)
                ],
                out_specs=pl.BlockSpec((Bblk, n_out), lambda b, c: (b, 0)),
                scratch_shapes=[pltpu.VMEM((Bblk, HID), jnp.float32)] * 5,
            ),
            compiler_params=pltpu.CompilerParams(
                dimension_semantics=("parallel", "arbitrary"),
                vmem_limit_bytes=_vmem_limit_bytes(),
            ),
        )(gates0_tm, whh0, w1, b1, wout, bout)

    try:
        return jax.block_until_ready(call(True))
    except Exception:
        # pipeline_mode / Buffered(1) unsupported on this Pallas build.
        return call(False)


# ----------------------------------------------------------------------------
# Full forward (glue in plain JAX) + pure-JAX reference
# ----------------------------------------------------------------------------
def net_forward(x, params, n_out):
    B, T, C, H, W = x.shape
    D = C * H * W
    x_flat = x.reshape(B * T, D).astype(jnp.bfloat16)

    # per-frame features: (B*T, D) @ (D, 1280) + b -> bf16
    feats = matmul_bias(x_flat, params["w_feat"].astype(jnp.bfloat16),
                        params["b_feat"], jnp.bfloat16)

    # hoisted layer-0 LSTM input projection for ALL timesteps in one matmul;
    # bf16 output halves HBM writeback + the recurrence's per-chunk DMA/VMEM.
    gates0 = matmul_bias(feats, params["wih0"].astype(jnp.bfloat16),
                         params["b0"], jnp.bfloat16)
    gates0 = gates0.reshape(B, T, GATES)

    # Batch block: as close to the MXU row width as the batch allows
    # (128 on v5e / unknown, up to 256 on v6e/v7x); keep >=2 blocks on the
    # parallel axis for v7x's two TensorCores when the batch permits.
    kind = _device_kind()
    cap = 256 if ("v6" in kind or "v7" in kind) else 128
    b8 = ((B + 7) // 8) * 8
    nblk = -(-b8 // min(cap, b8))
    if "v7" in kind and nblk < 2 and b8 >= 16:
        nblk = 2
    Bblk = ((-(-b8 // nblk) + 7) // 8) * 8
    B_pad = Bblk * nblk

    if B_pad != B:
        gates0 = jnp.pad(gates0, ((0, B_pad - B), (0, 0), (0, 0)))
    # Time-major layout: each per-step (Bblk, 4H) slab is sublane-contiguous.
    gates0_tm = jnp.transpose(gates0, (1, 0, 2))     # (T, B_pad, 4H) bf16

    # Fused layer-1 weight: [Wih1 ; Whh1] -> (1024, 4H) bf16.
    w1 = jnp.concatenate([params["wih1"], params["whh1"]],
                         axis=0).astype(jnp.bfloat16)

    out = lstm_head(gates0_tm,
                    params["whh0"].astype(jnp.bfloat16),
                    w1, params["b1"], params["wout"], params["bout"],
                    Bblk, T)
    return out[:B]


def net_forward_ref(x, p, n_out):
    """Pure-JAX reference doing the same math (bf16 matmul operands / bf16
    gates0 storage, f32 accumulation and f32 h/c state)."""
    B, T, C, H, W = x.shape
    xb = x.reshape(B * T, C * H * W).astype(jnp.bfloat16)
    feats = (jnp.dot(xb, p["w_feat"].astype(jnp.bfloat16),
                     preferred_element_type=jnp.float32)
             + p["b_feat"]).astype(jnp.bfloat16)
    gates0 = (jnp.dot(feats, p["wih0"].astype(jnp.bfloat16),
                      preferred_element_type=jnp.float32)
              + p["b0"]).astype(jnp.bfloat16)
    seq_g0 = gates0.reshape(B, T, GATES).transpose(1, 0, 2)   # (T, B, 4H)

    whh0 = p["whh0"].astype(jnp.bfloat16)
    wih1 = p["wih1"].astype(jnp.bfloat16)
    whh1 = p["whh1"].astype(jnp.bfloat16)

    def cell(gates, c):
        i = jax.nn.sigmoid(gates[:, :HID])
        f = jax.nn.sigmoid(gates[:, HID:2 * HID])
        g = jnp.tanh(gates[:, 2 * HID:3 * HID])
        o = jax.nn.sigmoid(gates[:, 3 * HID:])
        c = f * c + i * g
        h = o * jnp.tanh(c)
        return h, c

    def step(carry, g0_t):
        h0, c0, h1, c1 = carry
        h0, c0 = cell(g0_t.astype(jnp.float32)
                      + jnp.dot(h0.astype(jnp.bfloat16), whh0,
                                preferred_element_type=jnp.float32), c0)
        h1, c1 = cell(jnp.dot(h0.astype(jnp.bfloat16), wih1,
                              preferred_element_type=jnp.float32)
                      + jnp.dot(h1.astype(jnp.bfloat16), whh1,
                                preferred_element_type=jnp.float32)
                      + p["b1"], c1)
        return (h0, c0, h1, c1), h1

    init = tuple(jnp.zeros((B, HID), jnp.float32) for _ in range(4))
    _, h1s = jax.lax.scan(step, init, seq_g0)   # (T, B, HID)
    return h1s.mean(axis=0) @ p["wout"] + p["bout"]


if __name__ == "__main__":
    B, T, C, H, W = 2, 4, 3, 16, 16
    n_out = 10
    D = C * H * W

    key = jax.random.PRNGKey(0)
    ks = jax.random.split(key, 12)

    def init(k, shape, fan_in):
        return (jax.random.normal(k, shape, jnp.float32) / np.sqrt(fan_in)).astype(jnp.float32)

    x = jax.random.normal(ks[0], (B, T, C, H, W), jnp.float32)

    params = {
        "w_feat": init(ks[1], (D, FEAT), D),
        "b_feat": init(ks[2], (1, FEAT), FEAT),
        # LSTM layer 0 (input 1280 -> hidden 512); b = b_ih + b_hh combined
        "wih0": init(ks[3], (FEAT, GATES), FEAT),
        "whh0": init(ks[4], (HID, GATES), HID),
        "b0": init(ks[5], (1, GATES), HID),
        # LSTM layer 1 (512 -> 512)
        "wih1": init(ks[6], (HID, GATES), HID),
        "whh1": init(ks[7], (HID, GATES), HID),
        "b1": init(ks[8], (1, GATES), HID),
        # output Linear(512, n_out)
        "wout": init(ks[9], (HID, n_out), HID),
        "bout": init(ks[10], (1, n_out), HID),
    }

    out = net_forward(x, params, n_out)
    out = jax.block_until_ready(out)

    ref = jax.block_until_ready(net_forward_ref(x, params, n_out))
    np.testing.assert_allclose(np.asarray(out), np.asarray(ref), rtol=1e-2, atol=1e-2)
    assert out.shape == (B, n_out)

    print("KERNEL_OK")
</pallas_src>

<mosaic_0001>
module attributes {stable_mosaic.version = 11 : i64} {
  func.func @_mm_bias_kernel(%arg0: i32, %arg1: i32, %arg2: i32, %arg3: memref<16x384xbf16, #tpu.memory_space<vmem>>, %arg4: memref<384x256xbf16, #tpu.memory_space<vmem>>, %arg5: memref<1x256xf32, #tpu.memory_space<vmem>>, %arg6: memref<16x256xbf16, #tpu.memory_space<vmem>>, %arg7: memref<16x256xf32, #tpu.memory_space<vmem>>) attributes {dimension_semantics = [#tpu.dimension_semantics<parallel>, #tpu.dimension_semantics<parallel>, #tpu.dimension_semantics<arbitrary>], iteration_bounds = array<i64: 1, 5, 2>, scalar_prefetch = 0 : i64, scratch_operands = 1 : i64, tpu.core_type = #tpu.core_type<tc>, window_params = [{transform_indices = @transform_0, window_bounds = array<i64: 16, 384>}, {transform_indices = @transform_1, window_bounds = array<i64: 384, 256>}, {transform_indices = @transform_2, window_bounds = array<i64: 1, 256>}, {transform_indices = @transform_3, window_bounds = array<i64: 16, 256>}]} {
    %c0_i32 = arith.constant 0 : i32
    %0 = arith.cmpi eq, %arg2, %c0_i32 : i32
    %1 = arith.extui %0 : i1 to i32
    %c0_i32_0 = arith.constant 0 : i32
    %2 = arith.cmpi ne, %1, %c0_i32_0 : i32
    scf.if %2 {
      %cst_9 = arith.constant 0.000000e+00 : f32
      %12 = vector.broadcast %cst_9 : f32 to vector<16x256xf32>
      %c0_10 = arith.constant 0 : index
      %c0_11 = arith.constant 0 : index
      %13 = vector.load %arg7[%c0_10, %c0_11] : memref<16x256xf32, #tpu.memory_space<vmem>>, vector<16x256xf32>
      tpu.vector_store %arg7[%c0_10, %c0_11], %12 {strides = array<i32>} : memref<16x256xf32, #tpu.memory_space<vmem>>, vector<16x256xf32>,
    } else {
    }
    %c0 = arith.constant 0 : index
    %c0_1 = arith.constant 0 : index
    %3 = vector.load %arg7[%c0, %c0_1] : memref<16x256xf32, #tpu.memory_space<vmem>>, vector<16x256xf32>
    %c0_2 = arith.constant 0 : index
    %c0_3 = arith.constant 0 : index
    %4 = vector.load %arg3[%c0_2, %c0_3] : memref<16x384xbf16, #tpu.memory_space<vmem>>, vector<16x384xbf16>
    %c0_4 = arith.constant 0 : index
    %c0_5 = arith.constant 0 : index
    %5 = vector.load %arg4[%c0_4, %c0_5] : memref<384x256xbf16, #tpu.memory_space<vmem>>, vector<384x256xbf16>
    %cst = arith.constant dense<0.000000e+00> : vector<16x256xf32>
    %6 = tpu.matmul %4, %5, %cst {dimension_numbers = #tpu.dot_dimension_numbers<[1], [0], [0], [1], [0, 0, 1, 1], [], []>} : vector<16x384xbf16>, vector<384x256xbf16>, vector<16x256xf32> -> vector<16x256xf32>
    %7 = arith.addf %3, %6 : vector<16x256xf32>
    %c0_6 = arith.constant 0 : index
    %c0_7 = arith.constant 0 : index
    %8 = vector.load %arg7[%c0_6, %c0_7] : memref<16x256xf32, #tpu.memory_space<vmem>>, vector<16x256xf32>
    tpu.vector_store %arg7[%c0_6, %c0_7], %7 {strides = array<i32>} : memref<16x256xf32, #tpu.memory_space<vmem>>, vector<16x256xf32>,
    %c1_i32 = arith.constant 1 : i32
    %9 = arith.cmpi eq, %arg2, %c1_i32 : i32
    %10 = arith.extui %9 : i1 to i32
    %c0_i32_8 = arith.constant 0 : i32
    %11 = arith.cmpi ne, %10, %c0_i32_8 : i32
    scf.if %11 {
      %c0_9 = arith.constant 0 : index
      %c0_10 = arith.constant 0 : index
      %12 = vector.load %arg7[%c0_9, %c0_10] : memref<16x256xf32, #tpu.memory_space<vmem>>, vector<16x256xf32>
      %c0_11 = arith.constant 0 : index
      %c0_12 = arith.constant 0 : index
      %13 = vector.load %arg5[%c0_11, %c0_12] : memref<1x256xf32, #tpu.memory_space<vmem>>, vector<1x256xf32>
      %14 = vector.broadcast %13 : vector<1x256xf32> to vector<16x256xf32>
      %15 = arith.addf %12, %14 : vector<16x256xf32>
      %16 = arith.truncf %15 : vector<16x256xf32> to vector<16x256xbf16>
      %c0_13 = arith.constant 0 : index
      %c0_14 = arith.constant 0 : index
      %17 = vector.load %arg6[%c0_13, %c0_14] : memref<16x256xbf16, #tpu.memory_space<vmem>>, vector<16x256xbf16>
      tpu.vector_store %arg6[%c0_13, %c0_14], %16 {strides = array<i32>} : memref<16x256xbf16, #tpu.memory_space<vmem>>, vector<16x256xbf16>,
    } else {
    }
    return
  }
  func.func @transform_0(%arg0: i32, %arg1: i32, %arg2: i32) -> (i32, i32) {
    %c0_i32 = arith.constant 0 : i32
    return %arg0, %arg2 : i32, i32
  }
  func.func @transform_1(%arg0: i32, %arg1: i32, %arg2: i32) -> (i32, i32) {
    %c0_i32 = arith.constant 0 : i32
    return %arg2, %arg1 : i32, i32
  }
  func.func @transform_2(%arg0: i32, %arg1: i32, %arg2: i32) -> (i32, i32) {
    %c0_i32 = arith.constant 0 : i32
    %c0_i32_0 = arith.constant 0 : i32
    return %c0_i32, %arg1 : i32, i32
  }
  func.func @transform_3(%arg0: i32, %arg1: i32, %arg2: i32) -> (i32, i32) {
    %c0_i32 = arith.constant 0 : i32
    return %arg0, %arg1 : i32, i32
  }
}

</mosaic_0001>

<bundles_post_ra>
// kernel: tpu_custom_call.1
= control target key start
LH: loop header
LB: loop body
LE: loop exit
PB: predicated region body
PF: predicated region fallthrough
CT: control target
= control target key end

     0   :  { %s1988_s0 = inlined_call_operand.hbm [shape: bf16[16,768], index: 0, kind: input, shape index: {}]   ;;  %s1989_s1 = inlined_call_operand.hbm [shape: bf16[768,1280], index: 1, kind: input, shape index: {}]   ;;  %s1990_s2 = inlined_call_operand.hbm [shape: f32[1,1280], index: 2, kind: input, shape index: {}]   ;;  %s1991_s3 = inlined_call_operand.hbm [shape: bf16[16,1280], index: 3, kind: output, shape index: {}]  }
   0x1   :  { %2003 = sst [smem:[#allocation20_spill]] %s1988_s0 }
   0x2   :  { %2004 = sst [smem:[#allocation21_spill]] %s1989_s1 }
   0x3   :  { %2005 = sst [smem:[#allocation22_spill]] %s1991_s3 }
   0x4   :  { %8 = vsyncpa [#allocation4], 0 }
   0x5   :  { %10 = vsyncpa [#allocation4 + $0x1], 0 }
   0x6   :  { %11 = vsyncpa [#allocation7], 0 }
   0x7   :  { %13 = vsyncpa [#allocation7 + $0x1], 0 }
   0x8   :  { %14 = vsyncpa [#allocation5], 0 }
   0x9   :  { %16 = vsyncpa [#allocation5 + $0x1], 0  ;;  %s1503_s12 = smov 0   ;;  %s1505_s13 = smov 0  }
   0xa   :  { %s1507_s14 = smov 0   ;;  %s1509_s15 = smov 0  }
   0xb   :  { %s1511_s16 = smov 0   ;;  %s1513_s17 = smov 0  }
   0xc   :  { %s1515_s18 = smov 0   ;;  %s1517_s19 = smov 0  }
   0xd   :  { %s1519_s20 = smov 0   ;;  %s1521_s21 = smov 0  }
   0xe   :  { %s1523_s22 = smov 0   ;;  %s1525_s23 = smov 0  }
   0xf   :  { %s1527_s24 = smov 0   ;;  %s1529_s25 = smov 0  }
  0x10 LB: > { %2006 = sst [smem:[#allocation14_spill]] %s1454_s22  ;;  %s34_s26 = sadd.s32 1, %s1458_s23  ;;  %s1466_s25 = sphi %s1529_s25, %s22_s25   ;;  %s1462_s24 = sphi %s1527_s24, %s2046_s24   ;;  %s1458_s23 = sphi %s1525_s23, %s2056_s23   ;;  %s1454_s22 = sphi %s1523_s22, %s2044_s22   ;;  %s1450_s21 = sphi %s1521_s21, %s2043_s21   ;;  %s1446_s20 = sphi %s1519_s20, %s2055_s20   ;;  %s1442_s19 = sphi %s1517_s19, %s2054_s19   ;;  %s1438_s18 = sphi %s1515_s18, %s2053_s18   ;;  %s1434_s17 = sphi %s1513_s17, %s2052_s17   ;;  %s1430_s16 = sphi %s1511_s16, %s2051_s16   ;;  %s1426_s15 = sphi %s1509_s15, %s2050_s15   ;;  %s1422_s14 = sphi %s1507_s14, %s2049_s14   ;;  %s1418_s13 = sphi %s1505_s13, %s2048_s13   ;;  %s1414_s12 = sphi %s1503_s12, %s2047_s12  }
  0x11   : > { %2007 = sst [smem:[#allocation15_spill]] %s1458_s23  ;;  %p1575_p0 = scmp.ge.s32.totalorder %s34_s26, 2 }
  0x12   : > { %2008 = sst [smem:[#allocation16_spill]] %s1462_s24  ;;  %p1994_p1 = scmp.eq.s32.totalorder %s1466_s25, 0 }
  0x13   : > { %p85_p2 = scmp.ne.s32.totalorder %s1434_s17, %s1430_s16  ;;  %s2058_s26 = smov (%p1575_p0, %s34_s26), 0 }
  0x14   : > { %2010 = sst [smem:[#allocation17_spill]] %s2058_s26  ;;  %p1993_p5 = scmp.lt.s32.totalorder %s1466_s25, 10 }
  0x15   : > { %p87_p3 = por %p85_p2, %p1994_p1  ;;  %s193_s30 = sand.u32 1, %s1466_s25  }
  0x16   : > { %s195_s4 = sand.u32 1, %s1434_s17   ;;  %s916_s6 = sshll.u32 %s1462_s24, 1 }
  0x17   : > { %s994_s5 = smul.u32 384, %s195_s4  ;;  %p1598_p6 = pnand %p1993_p5, %p87_p3 }
  0x18   : > { %s1021_s7 = smul.u32 480, %s1458_s23  ;;  %s2012_s1 = sld [smem:[#allocation21_spill]] }
  0x19   : > { %s197_s8 = scalar_lea.vmem [#allocation6], %s994_s5  ;;  %s1609_s4 = scalar_lea.sflag [#allocation7], %s193_s30 }
  0x1a   : > { %s207_s9 = sshll.u32 %s197_s8, 4  ;;  %s204_s11 = sadd.s32 %s1021_s7, %s916_s6  ;;  %s1602_s9 = int_to_ptr.vmem [resolvable:$true] %s207_s9 }
  0x1b   : > { %s917_s29 = sshll.u32 %s204_s11, 6  ;;  %p1224_p8 = pneg %p1598_p6 }
  0x1e   : > { %s1607_s22 = scalar_lea.hbm %s2012_s1, %s917_s29  ;;  %s1227_s3 = scalar_lea.hbm %s2012_s1, 61440 }
  0x1f   : > { %s1222_s5 = scalar_lea.hbm %s1607_s22, 6144  ;;  %p1228_p11 = scmp.lt.u32.totalorder %s1607_s22, %s2012_s1 }
  0x20   : > { %p1223_p7 = scmp.ne.s32.totalorder %s1607_s22, %s1222_s5  ;;  %p1229_p12 = scmp.lt.u32.totalorder %s1227_s3, %s1222_s5 }
  0x21   : > { %p1231_p2 = scmp.lt.u32.totalorder %s1222_s5, %s1607_s22 }
  0x22   : > { %p1225_p9 = pnand %p1224_p8, %p1223_p7  ;;  %p1230_p13 = por %p1229_p12, %p1228_p11 }
  0x24   : > { %p1226_p10 = pneg %p1225_p9  ;;  %p1232_p3 = por %p1231_p2, %p1230_p13 }
  0x26   : > { %p1233_p4 = pnand %p1232_p3, %p1226_p10 }
  0x28   : > { %1236 = shalt.err (!%p1233_p4)
}
  0x29   : > { %s1237_s30 = scalar_lea.vmem %s1602_s9, 6144  ;;  %s1468_s8 = smov [#allocation6]  }
  0x2a   : > { %p1238_p7 = scmp.ne.s32.totalorder %s1602_s9, %s1237_s30  ;;  %s1242_s11 = sshll.u32 %s1468_s8, 4  ;;  %s1243_s11 = int_to_ptr.vmem [resolvable:$false] %s1242_s11 }
  0x2b   : > { %s1244_s6 = scalar_lea.vmem %s1243_s11, 12288  ;;  %p1245_p1 = scmp.lt.s32.totalorder %s1602_s9, %s1243_s11 }
  0x2c   : > { %p1240_p9 = pnand %p1238_p7, %p1224_p8  ;;  %p1246_p11 = scmp.lt.s32.totalorder %s1244_s6, %s1237_s30 }
  0x2e   : > { %p1241_p5 = pneg %p1240_p9  ;;  %p1247_p12 = por %p1246_p11, %p1245_p1 }
  0x30   : > { %p1248_p13 = pnand %p1247_p12, %p1241_p5 }
  0x32   : > { %1251 = shalt.err (!%p1248_p13)
}
  0x33   : > { %s1469_s5 = smov 640   ;;  %s1470_s7 = smov 128  }
  0x34   : > { %s1471_s3 = smov 8   ;;  %p921_p1 = scmp.ge.s32.totalorder %s1466_s25, 1 }
  0x35   : > { %1012 = dma.hbm_to_vmem [thread:$0]  (!%p1598_p6), %s1607_s22, 6144, %s1602_s9, %s1609_s4, %s1469_s5, %s1470_s7, %s1471_s3  }
  0x36   : > { %p234_p4 = scmp.lt.s32.totalorder %s1466_s25, 11  ;;  %s1645_s29 = ssub.s32 %s1458_s23, %s2058_s26 }
  0x37   : > { %p48_p8 = scmp.eq.s32.totalorder %s1645_s29, 0  ;;  %s50_s30 = sadd.s32 1, %s1446_s20 }
  0x38   : > { %p1639_p5 = pnand %p921_p1, %p234_p4  ;;  %p57_p10 = scmp.ne.s32.totalorder %s1446_s20, %s1442_s19 }
  0x39   : > { %s1654_s8 = scalar_select %p48_p8, %s1446_s20, %s50_s30  }
  0x3a   : > { %s2013_s27 = scalar_select %p1639_p5, 1, 0 }
  0x3b   : > { %2014 = sst [smem:[#allocation18_spill]] %s1654_s8  ;;  %p2015_p3 = scmp.eq.s32.totalorder %s1466_s25, 0 }
  0x3c   : > { %s169_s11 = sand.u32 1, %s1446_s20   ;;  %s984_s22 = smul.u32 192, %s1458_s23 }
  0x3d   : > { %p59_p7 = por %p2015_p3, %p57_p10  ;;  %s993_s10 = smul.u32 24, %s169_s11 }
  0x3e   : > { %p2016_p6 = scmp.lt.s32.totalorder %s1466_s25, 10  ;;  %s2018_s0 = sld [smem:[#allocation20_spill]] }
  0x3f   : > { %s173_s3 = scalar_lea.vmem [#allocation3], %s993_s10  ;;  %s1673_s1 = scalar_lea.sflag [#allocation4], %s169_s11 }
  0x40   : > { %p1662_p9 = pnand %p2016_p6, %p59_p7  ;;  %s183_s30 = sshll.u32 %s173_s3, 4  ;;  %s1671_s30 = int_to_ptr.vmem [resolvable:$true] %s183_s30 }
  0x42   : > { %p1254_p12 = pneg %p1662_p9 }
  0x44   : > { %s1669_s7 = scalar_lea.hbm %s2018_s0, %s984_s22  ;;  %s1257_s5 = scalar_lea.hbm %s2018_s0, 768 }
  0x45   : > { %s1252_s26 = scalar_lea.hbm %s1669_s7, 384  ;;  %p1258_p4 = scmp.lt.u32.totalorder %s1669_s7, %s2018_s0 }
  0x46   : > { %p1253_p11 = scmp.ne.s32.totalorder %s1669_s7, %s1252_s26  ;;  %p1259_p8 = scmp.lt.u32.totalorder %s1257_s5, %s1252_s26 }
  0x47   : > { %p1261_p3 = scmp.lt.u32.totalorder %s1252_s26, %s1669_s7 }
  0x48   : > { %p1255_p13 = pnand %p1254_p12, %p1253_p11  ;;  %p1260_p10 = por %p1259_p8, %p1258_p4 }
  0x4a   : > { %p1256_p1 = pneg %p1255_p13  ;;  %p1262_p7 = por %p1261_p3, %p1260_p10 }
  0x4c   : > { %p1263_p6 = pnand %p1262_p7, %p1256_p1 }
  0x4e   : > { %1266 = shalt.err (!%p1263_p6)
}
  0x4f   : > { %s1267_s11 = scalar_lea.vmem %s1671_s30, 384  ;;  %s1472_s10 = smov [#allocation3]  }
  0x50   : > { %p1268_p11 = scmp.ne.s32.totalorder %s1671_s30, %s1267_s11  ;;  %s1272_s3 = sshll.u32 %s1472_s10, 4  ;;  %s1273_s3 = int_to_ptr.vmem [resolvable:$false] %s1272_s3 }
  0x51   : > { %s1274_s23 = scalar_lea.vmem %s1273_s3, 768  ;;  %p1275_p5 = scmp.lt.s32.totalorder %s1671_s30, %s1273_s3 }
  0x52   : > { %p1270_p13 = pnand %p1268_p11, %p1254_p12  ;;  %p1276_p4 = scmp.lt.s32.totalorder %s1274_s23, %s1267_s11 }
  0x54   : > { %p1271_p2 = pneg %p1270_p13  ;;  %p1277_p8 = por %p1276_p4, %p1275_p5 }
  0x56   : > { %p1278_p10 = pnand %p1277_p8, %p1271_p2 }
  0x58   : > { %1281 = shalt.err (!%p1278_p10)
}
  0x59   : > { %s1473_s26 = smov 384   ;;  %s1474_s8 = smov 192  }
  0x5a   : > { %s1475_s22 = smov 12   ;;  %s1702_s6 = sadd.s32 4294967295, %s1466_s25  }
  0x5b   : > { %1009 = dma.hbm_to_vmem [thread:$0]  (!%p1662_p9), %s1669_s7, 384, %s1671_s30, %s1673_s1, %s1473_s26, %s1474_s8, %s1475_s22  }
  0x5c   : > { %s912_s5 = sadd.s32 4294967294, %s1466_s25   ;;  %s2019_s11 = sadd.s32 1, %s1462_s24 }
  0x5d   : > { %s2060_s11 = smov (!%p1575_p0, %s2019_s11), %s1462_s24  ;;  %p64_p5 = scmp.eq.s32.totalorder %s1702_s6, 0 }
  0x5e   : > { %s104_s9 = sadd.s32 1, %s1422_s14  ;;  %p39_p2 = scmp.ge.s32.totalorder %s2060_s11, 5 }
  0x5f   : > { %p111_p9 = scmp.ne.s32.totalorder %s1422_s14, %s1418_s13  ;;  %p2020_p12 = scmp.ne.s32.totalorder %s1442_s19, %s1438_s18 }
  0x60   : > { %p2022_p3 = scmp.ne.s32.totalorder %s1430_s16, %s1426_s15  ;;  %s2062_s11 = smov (%p39_p2, %s2060_s11), 0 }
  0x61   : > { %p1719_p1 = por %p64_p5, %p2020_p12  ;;  %2024 = sst [smem:[#allocation19_spill]] %s2062_s11 }
  0x62   : > { %p1728_p0 = por %p2022_p3, %p64_p5  ;;  %p2025_p7 = scmp.eq.s32.totalorder %s1466_s25, 0 }
  0x63   : > { %s2021_s1 = scalar_select %p1719_p1, 1, 0 }
  0x64   : > { %s2023_s28 = scalar_select %p1728_p0, 1, 0 }
  0x65   : > { %p1739_p6 = por %p111_p9, %p2025_p7  ;;  %p117_p11 = scmp.ne.s32.totalorder %s1418_s13, %s1414_s12 }
  0x66   : > { %s74_s7 = ssub.s32 %s1462_s24, %s2062_s11  ;;  %p143_p13 = scmp.eq.s32.totalorder %s1702_s6, 9 }
  0x67   : > { %s75_s15 = sor.u32 %s74_s7, %s1645_s29  ;;  %p102_p4 = scmp.eq.s32.totalorder %s74_s7, 0 }
  0x68   : > { %p76_p8 = scmp.eq.s32.totalorder %s75_s15, 0  ;;  %p1754_p10 = por %p117_p11, %p64_p5 }
  0x69   : > { %s1759_s10 = scalar_select %p102_p4, %s1422_s14, %s104_s9  }
  0x6a   : > { %s2027_s30 = scalar_select %p1754_p10, 1, 0 }
  0x6b   : > { %s2028_s3 = sadd.s32 1, %s1434_s17  ;;  %p1769_p2 = por %p143_p13, %p111_p9 }
  0x6c   : > { %s1764_s23 = scalar_select %p76_p8, %s1434_s17, %s2028_s3  }
  0x6d   : > { %s2029_s26 = scalar_select %p1769_p2, 1, 0 }
  0x6e   : > { %p149_p12 = scmp.eq.s32.totalorder %s912_s5, 9  ;;  %s219_s29 = sand.u32 1, %s1422_s14  }
  0x6f   : > { %s985_s8 = sshll.u32 %s1462_s24, 5  ;;  %s918_s7 = sshll.u32 %s219_s29, 1 }
  0x70   : > { %p1778_p3 = por %p149_p12, %p117_p11  ;;  %s1785_s0 = scalar_lea.hbm %s1990_s2, %s985_s8 }
  0x71   : > { %s221_s3 = scalar_lea.vmem [#allocation8], %s918_s7  ;;  %p2031_p5 = scmp.lt.s32.totalorder %s1466_s25, 10 }
  0x72   : > { %s2030_s22 = scalar_select %p1778_p3, 1, 0 }
  0x73   : > { %s229_s11 = sshll.u32 %s221_s3, 4  ;;  %p1791_p9 = pnand %p2031_p5, %p1739_p6  ;;  %s230_s11 = int_to_ptr.vmem [resolvable:$true] %s229_s11 }
  0x74   : > { %s1282_s29 = scalar_lea.hbm %s1785_s0, 32  ;;  %s1287_s18 = scalar_lea.hbm %s1990_s2, 160 }
  0x75   : > { %p1283_p7 = scmp.ne.s32.totalorder %s1785_s0, %s1282_s29  ;;  %p1284_p11 = pneg %p1791_p9 }
  0x76   : > { %p1288_p6 = scmp.lt.u32.totalorder %s1785_s0, %s1990_s2  ;;  %p1289_p8 = scmp.lt.u32.totalorder %s1287_s18, %s1282_s29 }
  0x77   : > { %p1285_p13 = pnand %p1284_p11, %p1283_p7  ;;  %p1291_p5 = scmp.lt.u32.totalorder %s1282_s29, %s1785_s0 }
  0x78   : > { %p1290_p12 = por %p1289_p8, %p1288_p6 }
  0x79   : > { %p1286_p4 = pneg %p1285_p13 }
  0x7a   : > { %p1292_p3 = por %p1291_p5, %p1290_p12 }
  0x7c   : > { %p1293_p2 = pnand %p1292_p3, %p1286_p4 }
  0x7e   : > { %1296 = shalt.err (!%p1293_p2)
}
  0x7f   : > { %s1297_s3 = scalar_lea.vmem %s230_s11, 32  ;;  %s1476_s24 = smov [#allocation8]  }
  0x80   : > { %p1298_p10 = scmp.ne.s32.totalorder %s230_s11, %s1297_s3  ;;  %s1302_s8 = sshll.u32 %s1476_s24, 4  ;;  %s1303_s8 = int_to_ptr.vmem [resolvable:$false] %s1302_s8 }
  0x81   : > { %s1304_s7 = scalar_lea.vmem %s1303_s8, 64  ;;  %p1305_p0 = scmp.lt.s32.totalorder %s230_s11, %s1303_s8 }
  0x82   : > { %p1300_p7 = pnand %p1298_p10, %p1284_p11  ;;  %p1306_p1 = scmp.lt.s32.totalorder %s1304_s7, %s1297_s3 }
  0x84   : > { %p1301_p13 = pneg %p1300_p7  ;;  %p1307_p6 = por %p1306_p1, %p1305_p0 }
  0x86   : > { %p1308_p8 = pnand %p1307_p6, %p1301_p13 }
  0x88   : > { %1311 = shalt.err (!%p1308_p8)
}
  0x89   : > { %1015 = dma.hbm_to_vmem [thread:$0]  (!%p1791_p9), %s1785_s0, 32, %s230_s11, %s1609_s4  }
  0x8a   : > { %p2033_p2 = scmp.ne.s32.totalorder %s2013_s27, 0 }
  0x8b   : > { %s240_s29 = sand.u32 (!%p2033_p2), 1, %s1442_s19   ;;  %p2034_p10 = scmp.ne.s32.totalorder (!%p2033_p2), %s2021_s1, 0 }
  0x8c   : > { %238 = sbr.rel (%p2033_p2) target bundleno = 492 (0x1ec), region = 32  ;;  %s241_s24 = scalar_lea.sflag (!%p2033_p2), [#allocation4], %s240_s29 }
  0x8d   : > { %s996_s18 = smul.u32 (!%p2033_p2), 24, %s240_s29 }
  0x8f   : > { %s1820_s15 = scalar_lea.vmem (!%p2033_p2), [#allocation3], %s996_s18 }
  0x93   : > { %1397 = dma.done.wait (%p2034_p10), %s241_s24, 384  }
  0x94   : > { %1399 = vsyncadd (%p2034_p10), %s241_s24, 4294966912  ;;  %s249_s5 = sand.u32 1, %s1702_s6   ;;  %s251_s0 = sand.u32 1, %s1430_s16  }
  0x95   : > { %s997_s4 = smul.u32 384, %s251_s0  ;;  %s250_s27 = scalar_lea.sflag [#allocation7], %s249_s5 }
  0x96   : > { %p2035_p1 = scmp.ne.s32.totalorder %s2023_s28, 0 }
  0x97   : > { %s1828_s11 = scalar_lea.vmem [#allocation6], %s997_s4 }
  0x98   : > { %1401 = dma.done.wait (%p2035_p1), %s250_s27, 6144  }
  0x99   : > { %1403 = vsyncadd (%p2035_p1), %s250_s27, 4294961152  ;;  %s1835_s9 = sand.u32 1, %s1418_s13   ;;  %p2036_p0 = scmp.ne.s32.totalorder %s2027_s30, 0 }
  0x9a   : > { %s922_s1 = sshll.u32 %s1835_s9, 1 }
  0x9b   : > { %s1838_s3 = scalar_lea.vmem [#allocation8], %s922_s1 }
  0x9c   : > { %1405 = dma.done.wait (%p2036_p0), %s250_s27, 32  }
  0x9d   : > { %1407 = vsyncadd (%p2036_p0), %s250_s27, 4294967264  ;;  %s923_s6 = sshll.u32 %s1835_s9, 4  ;;  %p924_p3 = scmp.ne.s32.totalorder %s1450_s21, 0 }
  0x9e   : > { %s1845_s8 = scalar_lea.vmem [#allocation9], %s923_s6  ;;  %v1477_v0 = vmov (!%p924_p3), 0.0  }
  0x9f   : > { %306 = sbr.rel (%p924_p3) target bundleno = 166 (0xa6), region = 48  ;;  %307 = vst [vmem:[#allocation2] sm:$0xff] (!%p924_p3), %v1477_v0  ;;  %308 = vst [vmem:[#allocation2 + $0x8] sm:$0xff] (!%p924_p3), %v1477_v0 }
  0xa0   : > { %309 = vst [vmem:[#allocation2 + $0x10] sm:$0xff] (!%p924_p3), %v1477_v0  ;;  %310 = vst [vmem:[#allocation2 + $0x18] sm:$0xff] (!%p924_p3), %v1477_v0 }
  0xa6 PF: > { %v1146_v1 = vld [vmem:[%s1828_s11 + $0x4] ss:$8 sps:$4 sm:$0xff]   ;;  %v1148_v2 = vld [vmem:[%s1828_s11] ss:$8 sps:$4 sm:$0xff]   ;;  %v1478_v3 = vmov 0   ;;  %v311_v57 = vld [vmem:[#allocation2] sm:$0xff] }
  0xa7   : > { %698 = vmatprep.mubr.bf16.mxu0 %v1478_v3  ;;  %623 = vmatprep.subr.bf16.mxu1 %v1146_v1  ;;  %v1149_v4 = vld [vmem:[%s1828_s11 + $0x14] ss:$8 sps:$4 sm:$0xff]   ;;  %v1151_v5 = vld [vmem:[%s1828_s11 + $0x10] ss:$8 sps:$4 sm:$0xff]   ;;  %v1152_v6 = vld [vmem:[%s1828_s11 + $0x24] ss:$8 sps:$4 sm:$0xff]  }
  0xa8   : > { %624 = vmatpush1.bf16.msra.mxu1 %v1148_v2  ;;  %v1154_v7 = vld [vmem:[%s1828_s11 + $0x20] ss:$8 sps:$4 sm:$0xff]   ;;  %v1155_v8 = vld [vmem:[%s1828_s11 + $0x34] ss:$8 sps:$4 sm:$0xff]   ;;  %v1157_v9 = vld [vmem:[%s1828_s11 + $0x30] ss:$8 sps:$4 sm:$0xff]  }
  0xa9   : > { %625 = vmatprep.subr.bf16.mxu1 %v1149_v4  ;;  %v1170_v10 = vld [vmem:[%s1828_s11 + $0x104] ss:$8 sps:$4 sm:$0xff]   ;;  %v1172_v11 = vld [vmem:[%s1828_s11 + $0x100] ss:$8 sps:$4 sm:$0xff]   ;;  %v1176_v13 = vld [vmem:[%s1828_s11 + $0x114] ss:$8 sps:$4 sm:$0xff]  }
  0xaa   : > { %v1158_v12 = vld [vmem:[%s1828_s11 + $0x44] ss:$8 sps:$4 sm:$0xff]   ;;  %666 = vmatprep.subr.bf16.mxu0 %v1170_v10  ;;  %v1178_v14 = vld [vmem:[%s1828_s11 + $0x110] ss:$8 sps:$4 sm:$0xff]   ;;  %v1160_v15 = vld [vmem:[%s1828_s11 + $0x40] ss:$8 sps:$4 sm:$0xff]  }
  0xab   : > { %667 = vmatpush1.bf16.msra.mxu0 %v1172_v11  ;;  %v1161_v16 = vld [vmem:[%s1828_s11 + $0x54] ss:$8 sps:$4 sm:$0xff]   ;;  %v1182_v17 = vld [vmem:[%s1828_s11 + $0x124] ss:$8 sps:$4 sm:$0xff]   ;;  %v1184_v18 = vld [vmem:[%s1828_s11 + $0x120] ss:$8 sps:$4 sm:$0xff]  }
  0xac   : > { %626 = vmatpush1.bf16.msra.mxu1 %v1151_v5  ;;  %668 = vmatprep.subr.bf16.mxu0 %v1176_v13  ;;  %v1163_v19 = vld [vmem:[%s1828_s11 + $0x50] ss:$8 sps:$4 sm:$0xff]   ;;  %v1188_v20 = vld [vmem:[%s1828_s11 + $0x134] ss:$8 sps:$4 sm:$0xff]   ;;  %v1164_v21 = vld [vmem:[%s1828_s11 + $0x64] ss:$8 sps:$4 sm:$0xff]  }
  0xad   : > { %627 = vmatprep.subr.bf16.mxu1 %v1152_v6  ;;  %v1190_v22 = vld [vmem:[%s1828_s11 + $0x130] ss:$8 sps:$4 sm:$0xff]   ;;  %v1166_v23 = vld [vmem:[%s1828_s11 + $0x60] ss:$8 sps:$4 sm:$0xff]   ;;  %v1194_v24 = vld [vmem:[%s1828_s11 + $0x144] ss:$8 sps:$4 sm:$0xff]  }
  0xae   : > { %v1167_v25 = vld [vmem:[%s1828_s11 + $0x74] ss:$8 sps:$4 sm:$0xff]   ;;  %v1196_v26 = vld [vmem:[%s1828_s11 + $0x140] ss:$8 sps:$4 sm:$0xff]   ;;  %v1169_v27 = vld [vmem:[%s1828_s11 + $0x70] ss:$8 sps:$4 sm:$0xff]  }
  0xaf   : > { %669 = vmatpush1.bf16.msra.mxu0 %v1178_v14  ;;  %v1200_v28 = vld [vmem:[%s1828_s11 + $0x154] ss:$8 sps:$4 sm:$0xff]   ;;  %v1173_v29 = vld [vmem:[%s1828_s11 + $0x84] ss:$8 sps:$4 sm:$0xff]   ;;  %v1202_v30 = vld [vmem:[%s1828_s11 + $0x150] ss:$8 sps:$4 sm:$0xff]  }
  0xb0   : > { %628 = vmatpush1.bf16.msra.mxu1 %v1154_v7  ;;  %670 = vmatprep.subr.bf16.mxu0 %v1182_v17  ;;  %v1175_v31 = vld [vmem:[%s1828_s11 + $0x80] ss:$8 sps:$4 sm:$0xff]   ;;  %v1206_v32 = vld [vmem:[%s1828_s11 + $0x164] ss:$8 sps:$4 sm:$0xff]   ;;  %v1179_v33 = vld [vmem:[%s1828_s11 + $0x94] ss:$8 sps:$4 sm:$0xff]  }
  0xb1   : > { %629 = vmatprep.subr.bf16.mxu1 %v1155_v8  ;;  %v1208_v34 = vld [vmem:[%s1828_s11 + $0x160] ss:$8 sps:$4 sm:$0xff]   ;;  %v1181_v36 = vld [vmem:[%s1828_s11 + $0x90] ss:$8 sps:$4 sm:$0xff]   ;;  %v1212_v37 = vld [vmem:[%s1828_s11 + $0x174] ss:$8 sps:$4 sm:$0xff]  }
  0xb2   : > { %v1221_v35 = vld [vmem:[%s1820_s15 + $0x4] ss:$12 sps:$4 sm:$0xff]   ;;  %v1218_v42 = vld [vmem:[%s1820_s15 + $0x8] ss:$12 sps:$4 sm:$0xff]   ;;  %v1219_v52 = vld [vmem:[%s1820_s15] ss:$12 sps:$4 sm:$0xff]  }
  0xb3   : > { %671 = vmatpush1.bf16.msra.mxu0 %v1184_v18  ;;  %v1185_v38 = vld [vmem:[%s1828_s11 + $0xa4] ss:$8 sps:$4 sm:$0xff]   ;;  %655 = vmatprep.mubr.bf16.mxu1 %v1221_v35  ;;  %v1214_v39 = vld [vmem:[%s1828_s11 + $0x170] ss:$8 sps:$4 sm:$0xff]   ;;  %v1187_v40 = vld [vmem:[%s1828_s11 + $0xa0] ss:$8 sps:$4 sm:$0xff]  }
  0xb4   : > { %630 = vmatpush1.bf16.msra.mxu1 %v1157_v9  ;;  %672 = vmatprep.subr.bf16.mxu0 %v1188_v20  ;;  %v1191_v41 = vld [vmem:[%s1828_s11 + $0xb4] ss:$8 sps:$4 sm:$0xff]   ;;  %v1193_v43 = vld [vmem:[%s1828_s11 + $0xb0] ss:$8 sps:$4 sm:$0xff]   ;;  %v1197_v44 = vld [vmem:[%s1828_s11 + $0xc4] ss:$8 sps:$4 sm:$0xff]  }
  0xb5   : > { %631 = vmatprep.subr.bf16.mxu1 %v1158_v12  ;;  %v1199_v45 = vld [vmem:[%s1828_s11 + $0xc0] ss:$8 sps:$4 sm:$0xff]   ;;  %v1203_v46 = vld [vmem:[%s1828_s11 + $0xd4] ss:$8 sps:$4 sm:$0xff]   ;;  %v1205_v47 = vld [vmem:[%s1828_s11 + $0xd0] ss:$8 sps:$4 sm:$0xff]  }
  0xb6   : > { %v1209_v48 = vld [vmem:[%s1828_s11 + $0xe4] ss:$8 sps:$4 sm:$0xff]   ;;  %v1211_v49 = vld [vmem:[%s1828_s11 + $0xe0] ss:$8 sps:$4 sm:$0xff]   ;;  %v1215_v50 = vld [vmem:[%s1828_s11 + $0xf4] ss:$8 sps:$4 sm:$0xff]  }
  0xb7   : > { %673 = vmatpush1.bf16.msra.mxu0 %v1190_v22  ;;  %v1217_v51 = vld [vmem:[%s1828_s11 + $0xf0] ss:$8 sps:$4 sm:$0xff]   ;;  %v313_v63 = vld [vmem:[#allocation2 + $0x10] sm:$0xff]  ;;  %v314_v3 = vld [vmem:[#allocation2 + $0x18] sm:$0xff]  ;;  %p976_p9 = scmp.ne.s32.totalorder %s1450_s21, 1 }
  0xb8   : > { %632 = vmatpush1.bf16.msra.mxu1 %v1160_v15  ;;  %674 = vmatprep.subr.bf16.mxu0 %v1194_v24  ;;  %v312_v60 = vld [vmem:[#allocation2 + $0x8] sm:$0xff]  ;;  %v727_v9 = vlaneseq (!%p976_p9)  ;;  %v725_v11 = vld [vmem:[%s1838_s3] sm:$0x3] (!%p976_p9) }
  0xb9   : > { %633 = vmatprep.subr.bf16.mxu1 %v1161_v16 }
  0xba   : > { %v728_v10 = vshrl.u32 (!%p976_p9), %v727_v9, 7 }
  0xbb   : > { %675 = vmatpush1.bf16.msra.mxu0 %v1196_v26 }
  0xbc   : > { %634 = vmatpush1.bf16.msra.mxu1 %v1163_v19  ;;  %676 = vmatprep.subr.bf16.mxu0 %v1200_v28  ;;  %v729_v13 = vsub.s32 (!%p976_p9), 0, %v728_v10  ;;  %v733_v14 = vsub.s32 (!%p976_p9), 1, %v728_v10 }
  0xbd   : > { %635 = vmatprep.subr.bf16.mxu1 %v1164_v21 }
  0xbe   : > { %v730_v18 = vrot.slane (!%p976_p9), %v725_v11, %v729_v13  ;;  %v734_v19 = vrot.slane (!%p976_p9), %v725_v11, %v733_v14 }
  0xbf   : > { %677 = vmatpush1.bf16.msra.mxu0 %v1202_v30 }
  0xc0   : > { %636 = vmatpush1.bf16.msra.mxu1 %v1166_v23  ;;  %678 = vmatprep.subr.bf16.mxu0 %v1206_v32 }
  0xc1   : > { %637 = vmatprep.subr.bf16.mxu1 %v1167_v25 }
  0xc3   : > { %679 = vmatpush1.bf16.msra.mxu0 %v1208_v34 }
  0xc4   : > { %638 = vmatpush1.bf16.msra.mxu1 %v1169_v27  ;;  %680 = vmatprep.subr.bf16.mxu0 %v1212_v37 }
  0xc5   : > { %639 = vmatprep.subr.bf16.mxu1 %v1173_v29 }
  0xc7   : > { %681 = vmatpush1.bf16.msra.mxu0 %v1214_v39 }
  0xc8   : > { %640 = vmatpush1.bf16.msra.mxu1 %v1175_v31 }
  0xc9   : > { %641 = vmatprep.subr.bf16.mxu1 %v1179_v33 }
  0xca   : > { %699 = vmatmul.mubr.bf16.vlgmr.msra.gmra.mrb[0].mxu0 %v1218_v42 }
  0xcc   : > { %642 = vmatpush1.bf16.msra.mxu1 %v1181_v36 }
  0xcd   : > { %643 = vmatprep.subr.bf16.mxu1 %v1185_v38 }
  0xd0   : > { %644 = vmatpush1.bf16.msra.mxu1 %v1187_v40 }
  0xd1   : > { %645 = vmatprep.subr.bf16.mxu1 %v1191_v41 }
  0xd4   : > { %646 = vmatpush1.bf16.msra.mxu1 %v1193_v43 }
  0xd5   : > { %647 = vmatprep.subr.bf16.mxu1 %v1197_v44 }
  0xd8   : > { %648 = vmatpush1.bf16.msra.mxu1 %v1199_v45 }
  0xd9   : > { %649 = vmatprep.subr.bf16.mxu1 %v1203_v46 }
  0xdc   : > { %650 = vmatpush1.bf16.msra.mxu1 %v1205_v47 }
  0xdd   : > { %651 = vmatprep.subr.bf16.mxu1 %v1209_v48 }
  0xe0   : > { %652 = vmatpush1.bf16.msra.mxu1 %v1211_v49 }
  0xe1   : > { %653 = vmatprep.subr.bf16.mxu1 %v1215_v50 }
  0xe4   : > { %654 = vmatpush1.bf16.msra.mxu1 %v1217_v51 }
  0xe7   : > { %656 = vmatmul.mubr.bf16.vlgmr.msra.gmra.mrb[0].mxu1 %v1219_v52 }
 0x19d   : > { %v700_v53 = vpop.f32.mrb[0].mxu0 }
 0x19e   : > { %v702_v54 = vpop.f32.mrb[1].mxu0 }
 0x19f   : > { %v704_v55 = vpop.f32.mrb[2].mxu0 }
 0x1a0   : > { %v706_v56 = vpop.f32.mrb[3].mxu0 }
 0x1ba   : > { %v657_v58 = vpop.f32.mrb[0].mxu1 }
 0x1bb   : > { %v701_v59 = vadd.f32 %v700_v53, %v657_v58  ;;  %v659_v61 = vpop.f32.mrb[1].mxu1 }
 0x1bc   : > { %v703_v62 = vadd.f32 %v702_v54, %v659_v61  ;;  %v661_v0 = vpop.f32.mrb[2].mxu1  ;;  %720 = sbr.rel (%p976_p9) target bundleno = 463 (0x1cf), region = 52 }
 0x1bd   : > { %v709_v1 = vadd.f32 %v701_v59, %v311_v57  ;;  %v705_v2 = vadd.f32 %v704_v55, %v661_v0  ;;  %v663_v4 = vpop.f32.mrb[3].mxu1 }
 0x1be   : > { %v710_v5 = vadd.f32 %v703_v62, %v312_v60  ;;  %v707_v6 = vadd.f32 %v706_v56, %v663_v4 }
 0x1bf   : > { %713 = vst [vmem:[#allocation2] sm:$0xff] %v709_v1  ;;  %v711_v7 = vadd.f32 %v705_v2, %v313_v63 }
 0x1c0   : > { %714 = vst [vmem:[#allocation2 + $0x8] sm:$0xff] %v710_v5  ;;  %v712_v8 = vadd.f32 %v707_v6, %v314_v3 }
 0x1c1   : > { %715 = vst [vmem:[#allocation2 + $0x10] sm:$0xff] %v711_v7 }
 0x1c2   : > { %716 = vst [vmem:[#allocation2 + $0x18] sm:$0xff] %v712_v8 }
 0x1c6   : > { %v721_v12 = vld [vmem:[#allocation2] sm:$0xff] }
 0x1c7   : > { %v722_v15 = vld [vmem:[#allocation2 + $0x8] sm:$0xff]  ;;  %v737_v20 = vadd.f32 %v730_v18, %v721_v12 }
 0x1c8   : > { %v723_v16 = vld [vmem:[#allocation2 + $0x10] sm:$0xff]  ;;  %v738_v21 = vadd.f32 %v734_v19, %v722_v15 }
 0x1c9   : > { %v724_v17 = vld [vmem:[#allocation2 + $0x18] sm:$0xff]  ;;  %v739_v22 = vadd.f32 %v730_v18, %v723_v16 }
 0x1ca   : > { %v740_v23 = vadd.f32 %v734_v19, %v724_v17  ;;  %v986_v24 = vpack.c.bf16 %v738_v21, %v737_v20 }
 0x1cc   : > { %v987_v25 = vpack.c.bf16 %v740_v23, %v739_v22  ;;  %753 = vst [vmem:[%s1845_s8] sm:$0xff] %v986_v24 }
 0x1ce   : > { %754 = vst [vmem:[%s1845_s8 + $0x8] sm:$0xff] %v987_v25 }
 0x1cf PF: > { %s2037_s21 = sld [smem:[#allocation14_spill]]  ;;  %s2038_s29 = sld [smem:[#allocation22_spill]] }
 0x1d0   : > { %s772_s24 = sshll.u32 %s1845_s8, 4  ;;  %s756_s15 = scalar_lea.sflag [#allocation5], %s1835_s9  ;;  %s1910_s24 = int_to_ptr.vmem [resolvable:$true] %s772_s24 }
 0x1d1   : > { %s1312_s5 = scalar_lea.vmem %s1910_s24, 256  ;;  %p2039_p4 = scmp.ne.s32.totalorder %s2029_s26, 0 }
 0x1d2   : > { %p1313_p11 = scmp.ne.s32.totalorder %s1910_s24, %s1312_s5  ;;  %s1479_s0 = smov [#allocation9]  }
 0x1d3   : > { %s1316_s4 = sshll.u32 %s1479_s0, 4  ;;  %s1317_s4 = int_to_ptr.vmem [resolvable:$false] %s1316_s4 }
 0x1d4   : > { %p1314_p12 = pnand %p1313_p11, %p2039_p4  ;;  %s1318_s27 = scalar_lea.vmem %s1317_s4, 512 }
 0x1d5   : > { %s988_s28 = sshll.u32 %s2037_s21, 7  ;;  %p1319_p7 = scmp.lt.s32.totalorder %s1910_s24, %s1317_s4 }
 0x1d6   : > { %s1907_s18 = scalar_lea.hbm %s2038_s29, %s988_s28  ;;  %p1315_p5 = pneg %p1314_p12 }
 0x1d7   : > { %p1320_p13 = scmp.lt.s32.totalorder %s1318_s27, %s1312_s5 }
 0x1d9   : > { %p1321_p6 = por %p1320_p13, %p1319_p7 }
 0x1db   : > { %p1322_p8 = pnand %p1321_p6, %p1315_p5 }
 0x1dd   : > { %1325 = shalt.err (!%p1322_p8)
}
 0x1de   : > { %s1326_s11 = scalar_lea.hbm %s1907_s18, 256  ;;  %s1330_s6 = scalar_lea.hbm %s2038_s29, 1280 }
 0x1df   : > { %p1327_p2 = scmp.ne.s32.totalorder %s1907_s18, %s1326_s11  ;;  %p1331_p0 = scmp.lt.u32.totalorder %s1907_s18, %s2038_s29 }
 0x1e0   : > { %p1332_p3 = scmp.lt.u32.totalorder %s1330_s6, %s1326_s11  ;;  %p1334_p11 = scmp.lt.u32.totalorder %s1326_s11, %s1907_s18 }
 0x1e1   : > { %p1328_p10 = pnand %p1327_p2, %p2039_p4 }
 0x1e2   : > { %p1333_p9 = por %p1332_p3, %p1331_p0 }
 0x1e3   : > { %p1329_p1 = pneg %p1328_p10 }
 0x1e4   : > { %p1335_p12 = por %p1334_p11, %p1333_p9 }
 0x1e6   : > { %p1336_p5 = pnand %p1335_p12, %p1329_p1 }
 0x1e8   : > { %1339 = shalt.err (!%p1336_p5)
}
 0x1e9   : > { %s1480_s28 = smov 128   ;;  %s1481_s30 = smov 640  }
 0x1ea   : > { %s1482_s7 = smov 8  }
 0x1eb   : > { %1004 = dma.vmem_to_hbm [thread:$0]  (%p2039_p4), %s1910_s24, 256, %s1907_s18, %s756_s15, %s1480_s28, %s1481_s30, %s1482_s7  }
 0x1ec PF: > { %p1022_p7 = scmp.ge.s32.totalorder %s1466_s25, 2  ;;  %s787_s5 = sand.u32 1, %s1414_s12  }
 0x1ed   : > { %p2040_p13 = scmp.ne.s32.totalorder %s2030_s22, 0  ;;  %s788_s0 = scalar_lea.sflag [#allocation5], %s787_s5 }
 0x1ef   : > { %p1017_p6 = pnand %p1022_p7, %p2040_p13 }
 0x1f1   : > { %1409 = dma.done.wait (!%p1017_p6), %s788_s0, 256  }
 0x1f2   : > { %1411 = vsyncadd (!%p1017_p6), %s788_s0, 4294967040  ;;  %s22_s25 = sadd.s32 1, %s1466_s25   ;;  %s2042_s26 = sld [smem:[#allocation18_spill]] }
 0x1f3   : > { %p1941_p8 = scmp.ge.s32.totalorder %s22_s25, 12   ;;  %s2043_s21 = sld [smem:[#allocation15_spill]] }
 0x1f4   : > { %s2044_s22 = sld [smem:[#allocation16_spill]]  ;;  %s2045_s9 = sld [smem:[#allocation17_spill]] }
 0x1f5   : > { %s2046_s24 = sld [smem:[#allocation19_spill]]  ;;  %s2047_s12 = smov %s1418_s13 }
 0x1f6   : > { %s2048_s13 = smov %s1422_s14  ;;  %s2049_s14 = smov %s1759_s10 }
 0x1f7   : > { %s2050_s15 = smov %s1430_s16  ;;  %s2051_s16 = smov %s1434_s17 }
 0x1f8   : > { %s2052_s17 = smov %s1764_s23  ;;  %s2053_s18 = smov %s1442_s19 }
 0x1f9   : > { %s2054_s19 = smov %s1446_s20  ;;  %s2055_s20 = smov %s2042_s26 }
 0x1fa   : > { %s2056_s23 = smov %s2045_s9  ;;  %21 = sbr.rel (!%p1941_p8) target bundleno = 16 (0x10), region = 109 }
 0x201   :  { %793 = vsyncpa [#allocation4], 1 }
 0x202   :  { %795 = vsyncpa [#allocation4 + $0x1], 1 }
 0x203   :  { %796 = vsyncpa [#allocation7], 1 }
 0x204   :  { %798 = vsyncpa [#allocation7 + $0x1], 1 }
 0x205   :  { %799 = vsyncpa [#allocation5], 1 }
 0x206   :  { %801 = vsyncpa [#allocation5 + $0x1], 1 }

</bundles_post_ra>
